<compile_context>
chip_gen: v7x
topology: tpu7x:2x2x1
jax: 0.10.0
libtpu: 0.0.40
codegen_flags: <defaults>
</compile_context>

<pallas_src>
import functools

import jax
import jax.numpy as jnp
from jax import lax
from jax.experimental import pallas as pl
from jax.experimental.pallas import tpu as pltpu


def _confusion_kernel(pred_ref, tgt_ref, out_ref, *, num_classes, batch_size,
                      tile_b, tiles_per_split, num_valid_cols, use_joint):
    s = pl.program_id(0)          # "parallel" split axis (megacore on v7x)
    t = pl.program_id(1)          # "arbitrary" reduction axis over batch tiles

    # Zero the resident accumulator once per split.
    @pl.when(t == 0)
    def _():
        out_ref[...] = jnp.zeros_like(out_ref)

    pred = pred_ref[...]                                  # (TILE_B, C) native dtype
    tgt = tgt_ref[...]                                    # (TILE_B, 1) int32
    tb, C = pred.shape

    col = lax.broadcasted_iota(jnp.int32, (tb, C), 1)
    if num_valid_cols == C:
        row_max = jnp.max(pred, axis=1, keepdims=True)
        is_max = pred == row_max
    else:
        # robust_logit_index == -1: ignore the last logit column for the argmax
        valid_col = col < num_valid_cols
        lowest = jnp.array(-jnp.inf, dtype=pred.dtype)
        row_max = jnp.max(jnp.where(valid_col, pred, lowest), axis=1,
                          keepdims=True)
        is_max = (pred == row_max) & valid_col

    # first (lowest-index) maximal column == torch.max(..., dim=1)[1]
    pred_idx = jnp.min(jnp.where(is_max, col, C), axis=1, keepdims=True)  # (tb,1)

    # Mask rows past the real batch (partial last tile / clamped out-of-range
    # tiles when the split count does not divide the tile count).
    g = s * tiles_per_split + t
    row = g * tile_b + lax.broadcasted_iota(jnp.int32, (tb, 1), 0)
    valid_row = row < batch_size

    if use_joint:
        # Joint one-hot over the flattened (target, pred) cell index: a single
        # lane-dense compare + one standard-form MXU op.  Best for small N.
        valid = (valid_row & (tgt >= 0) & (tgt < num_classes)
                 & (pred_idx < num_classes))
        key = jnp.where(valid, tgt * num_classes + pred_idx, -1)          # (tb,1)
        nn = num_classes * num_classes
        cell = lax.broadcasted_iota(jnp.int32, (tb, nn), 1)
        oh = (cell == key).astype(jnp.bfloat16)                           # (tb, N*N)
        ones = jnp.ones((1, tb), jnp.bfloat16)
        contrib = lax.dot_general(ones, oh,
                                  dimension_numbers=(((1,), (0,)), ((), ())),
                                  preferred_element_type=jnp.float32)     # (1, N*N)
        out_ref[0] += contrib
    else:
        cls = lax.broadcasted_iota(jnp.int32, (tb, num_classes), 1)
        oh_pred = (cls == pred_idx).astype(jnp.bfloat16)                  # (tb, N)
        oh_tgt = ((cls == tgt) & valid_row).astype(jnp.bfloat16)          # (tb, N)
        # cm[t, p] = sum_b oh_tgt[b, t] * oh_pred[b, p]  (contract batch on MXU)
        cm = lax.dot_general(oh_tgt, oh_pred,
                             dimension_numbers=(((0,), (0,)), ((), ())),
                             preferred_element_type=jnp.float32)          # (N, N)
        out_ref[0] += cm


def _pick_tile_b(B, C, itemsize, oh_width):
    """Largest batch tile whose lane-padded VMEM footprint stays in budget."""
    lane = 128
    c_pad = -(-C // lane) * lane
    oh_pad = -(-oh_width // lane) * lane
    sublane = max(8, 32 // max(1, itemsize))      # 8 f32 / 16 bf16 / 32 int8-fp8
    # Bytes per batch row resident in VMEM (lane-padded):
    per_row = (2 * c_pad * itemsize               # prediction block, double-buffered
               + 2 * lane * 4                     # (tile_b,1) int32 target pads to 128 lanes
               + 4 * c_pad * 4                    # argmax temporaries (iota/where/cmp)
               + 2 * oh_pad * 2                   # bf16 one-hot temporaries
               + oh_pad * 4)                      # int32 iota for the one-hot compare
    budget = 20 * 1024 * 1024                     # headroom under the 48 MiB scoped
                                                  # limit; fits v7x's 64 MiB physical
    tb = budget // per_row
    tb = (tb // sublane) * sublane
    tb = int(max(sublane, min(tb, 8192)))
    if tb >= B:
        return B       # single tile: block dims == full array dims (always legal)
    return tb


def _default_num_splits():
    # v7x has 2 TensorCores per chip; a leading "parallel" grid axis keeps both
    # busy with one resident accumulator each.  Single-TC chips get 1.
    try:
        kind = jax.devices()[0].device_kind.lower()
        if "v7" in kind or "tpu7" in kind:
            return 2
    except Exception:
        pass
    return 1


def confusion_matrix_values(prediction, target, num_classes,
                            robust_logit_index=None, tile_b=None,
                            num_splits=None):
    """prediction: (B, C) float, target: (B,) int -> (N, N) float32 matrix."""
    if robust_logit_index is not None:
        assert robust_logit_index == -1
    B, C = prediction.shape
    num_valid_cols = C - 1 if robust_logit_index is not None else C

    nn = num_classes * num_classes
    use_joint = nn <= 512     # joint (target, pred) one-hot only pays off for small N

    itemsize = prediction.dtype.itemsize
    if tile_b is None:
        tile_b = _pick_tile_b(B, C, itemsize, nn if use_joint else num_classes)
    tile_b = int(min(tile_b, B))
    num_tiles = pl.cdiv(B, tile_b)

    if num_splits is None:
        num_splits = _default_num_splits()
    num_splits = int(max(1, min(num_splits, num_tiles)))
    tiles_per_split = pl.cdiv(num_tiles, num_splits)
    needs_clamp = num_splits * tiles_per_split != num_tiles
    last_tile = num_tiles - 1

    def in_map(s, t):
        g = s * tiles_per_split + t
        if needs_clamp:
            # keep the DMA in bounds; the kernel masks those rows out
            g = jnp.minimum(g, last_tile)
        return (g, 0)

    target2d = target.reshape(B, 1).astype(jnp.int32)

    kernel = functools.partial(
        _confusion_kernel, num_classes=num_classes, batch_size=B,
        tile_b=tile_b, tiles_per_split=tiles_per_split,
        num_valid_cols=num_valid_cols, use_joint=use_joint)

    if use_joint:
        out_shape = jax.ShapeDtypeStruct((num_splits, 1, nn), jnp.float32)
        out_spec = pl.BlockSpec((1, 1, nn), lambda s, t: (s, 0, 0))
    else:
        out_shape = jax.ShapeDtypeStruct((num_splits, num_classes, num_classes),
                                         jnp.float32)
        out_spec = pl.BlockSpec((1, num_classes, num_classes),
                                lambda s, t: (s, 0, 0))

    cost = pl.CostEstimate(
        flops=2 * B * nn,
        transcendentals=0,
        bytes_accessed=B * C * itemsize + B * 4 + num_splits * nn * 4)

    partials = pl.pallas_call(
        kernel,
        out_shape=out_shape,
        grid_spec=pl.GridSpec(
            grid=(num_splits, tiles_per_split),
            in_specs=[
                pl.BlockSpec((tile_b, C), in_map),
                pl.BlockSpec((tile_b, 1), in_map),
            ],
            out_specs=out_spec,
        ),
        compiler_params=pltpu.CompilerParams(
            dimension_semantics=("parallel", "arbitrary"),
            vmem_limit_bytes=48 * 1024 * 1024),
        cost_estimate=cost,
    )(prediction, target2d)

    cm = jnp.sum(partials, axis=0)   # <= num_splits tiny matrices; trivial
    if use_joint:
        cm = cm.reshape(num_classes, num_classes)
    return cm


class ConfusionMatrix:
    """Lightweight stand-in for the reference ConfusionMatrix result object."""

    def __init__(self, values, labels=None):
        self._values = values
        self.labels = labels

    def update(self, mat):
        self._values = self._values + mat._values

    # TODO(synk): plot() (matplotlib figure rendering) has no Pallas equivalent.


class ConfusionMatrixMetric:
    """Mirrors the PyTorch module's forward semantics using the Pallas kernel."""

    def __init__(self, num_classes, robust_logit_index=None, labels=None):
        self.num_classes = num_classes
        self.labels = labels
        self.robust_logit_index = robust_logit_index
        if robust_logit_index is not None:
            assert robust_logit_index == -1

    def forward(self, prediction, target, tile_b=None, num_splits=None):
        values = confusion_matrix_values(
            prediction, target, self.num_classes,
            robust_logit_index=self.robust_logit_index,
            tile_b=tile_b, num_splits=num_splits)
        return ConfusionMatrix(values, self.labels)

    __call__ = forward


def _confusion_ref(prediction, target, num_classes, robust_logit_index=None):
    logits = prediction[:, :-1] if robust_logit_index is not None else prediction
    pred = jnp.argmax(logits, axis=1)
    cm = jnp.zeros((num_classes, num_classes), jnp.float32)
    return cm.at[target, pred].add(1.0)


if __name__ == "__main__":
    key = jax.random.PRNGKey(0)
    kp1, kt1, kp2, kt2, kp3, kt3 = jax.random.split(key, 6)

    # Case 1: joint one-hot path; forced multi-tile (tile_b=8 -> 3 tiles) with a
    # 2-way "parallel" split (exercises tile-index clamping and row masking).
    B, N = 20, 4
    pred1 = jax.random.normal(kp1, (B, N), dtype=jnp.float32)
    tgt1 = jax.random.randint(kt1, (B,), 0, N, dtype=jnp.int32)
    metric = ConfusionMatrixMetric(N)
    cm1 = metric(pred1, tgt1, tile_b=8, num_splits=2)._values
    jax.block_until_ready(cm1)
    ref1 = _confusion_ref(pred1, tgt1, N)
    assert jnp.allclose(cm1, ref1), (cm1, ref1)
    assert float(jnp.sum(cm1)) == float(B)

    # Case 2: robust_logit_index == -1 (extra logit column ignored), default tiling.
    pred2 = jax.random.normal(kp2, (B, N + 1), dtype=jnp.float32)
    tgt2 = jax.random.randint(kt2, (B,), 0, N, dtype=jnp.int32)
    metric_r = ConfusionMatrixMetric(N, robust_logit_index=-1)
    cm2 = metric_r(pred2, tgt2)._values
    jax.block_until_ready(cm2)
    ref2 = _confusion_ref(pred2, tgt2, N, robust_logit_index=-1)
    assert jnp.allclose(cm2, ref2), (cm2, ref2)

    # Case 3: outer-product path (N*N > 512), resident accumulation over 2 tiles.
    B3, N3 = 64, 40
    pred3 = jax.random.normal(kp3, (B3, N3), dtype=jnp.float32)
    tgt3 = jax.random.randint(kt3, (B3,), 0, N3, dtype=jnp.int32)
    metric3 = ConfusionMatrixMetric(N3)
    cm3 = metric3(pred3, tgt3, tile_b=32, num_splits=1)._values
    jax.block_until_ready(cm3)
    ref3 = _confusion_ref(pred3, tgt3, N3)
    assert jnp.allclose(cm3, ref3), (cm3, ref3)
    assert float(jnp.sum(cm3)) == float(B3)

    print("KERNEL_OK")
</pallas_src>

<mosaic_0001>
module attributes {stable_mosaic.version = 11 : i64} {
  func.func @_confusion_kernel(%arg0: i32, %arg1: i32, %arg2: memref<8x4xf32, #tpu.memory_space<vmem>>, %arg3: memref<8x1xi32, #tpu.memory_space<vmem>>, %arg4: memref<1x1x16xf32, #tpu.memory_space<vmem>>) attributes {dimension_semantics = [#tpu.dimension_semantics<parallel>, #tpu.dimension_semantics<arbitrary>], iteration_bounds = array<i64: 2, 2>, scalar_prefetch = 0 : i64, scratch_operands = 0 : i64, tpu.core_type = #tpu.core_type<tc>, window_params = [{transform_indices = @transform_0, window_bounds = array<i64: 8, 4>}, {transform_indices = @transform_1, window_bounds = array<i64: 8, 1>}, {transform_indices = @transform_2, window_bounds = array<i64: 1, 1, 16>}]} {
    %c0_i32 = arith.constant 0 : i32
    %0 = arith.cmpi eq, %arg1, %c0_i32 : i32
    %1 = arith.extui %0 : i1 to i32
    %c0_i32_0 = arith.constant 0 : i32
    %2 = arith.cmpi ne, %1, %c0_i32_0 : i32
    scf.if %2 {
      %cst_17 = arith.constant 0.000000e+00 : f32
      %50 = vector.broadcast %cst_17 : f32 to vector<1x1x16xf32>
      %c0_18 = arith.constant 0 : index
      %c0_19 = arith.constant 0 : index
      %c0_20 = arith.constant 0 : index
      %51 = vector.load %arg4[%c0_18, %c0_19, %c0_20] : memref<1x1x16xf32, #tpu.memory_space<vmem>>, vector<1x1x16xf32>
      tpu.vector_store %arg4[%c0_18, %c0_19, %c0_20], %50 {strides = array<i32>} : memref<1x1x16xf32, #tpu.memory_space<vmem>>, vector<1x1x16xf32>,
    } else {
    }
    %c0 = arith.constant 0 : index
    %c0_1 = arith.constant 0 : index
    %3 = vector.load %arg2[%c0, %c0_1] : memref<8x4xf32, #tpu.memory_space<vmem>>, vector<8x4xf32>
    %c0_2 = arith.constant 0 : index
    %c0_3 = arith.constant 0 : index
    %4 = vector.load %arg3[%c0_2, %c0_3] : memref<8x1xi32, #tpu.memory_space<vmem>>, vector<8x1xi32>
    %5 = tpu.iota {dimensions = array<i32: 1>} : vector<8x4xi32>
    %cst = arith.constant dense<0xFF800000> : vector<8xf32>
    %6 = vector.multi_reduction <maximumf>, %3, %cst [1] : vector<8x4xf32> to vector<8xf32>
    %7 = vector.shape_cast %6 : vector<8xf32> to vector<8x1xf32>
    %8 = vector.broadcast %7 : vector<8x1xf32> to vector<8x4xf32>
    %9 = arith.cmpf oeq, %3, %8 : vector<8x4xf32>
    %c4_i32 = arith.constant 4 : i32
    %10 = vector.broadcast %c4_i32 : i32 to vector<8x4xi32>
    %11 = arith.select %9, %5, %10 : vector<8x4xi1>, vector<8x4xi32>
    %cst_4 = arith.constant dense<2147483647> : vector<8xi32>
    %12 = vector.multi_reduction <minsi>, %11, %cst_4 [1] : vector<8x4xi32> to vector<8xi32>
    %13 = vector.shape_cast %12 : vector<8xi32> to vector<8x1xi32>
    %c2_i32 = arith.constant 2 : i32
    %14 = arith.muli %arg0, %c2_i32 : i32
    %15 = arith.addi %14, %arg1 : i32
    %c8_i32 = arith.constant 8 : i32
    %16 = arith.muli %15, %c8_i32 : i32
    %17 = tpu.iota {dimensions = array<i32: 0>} : vector<8x1xi32>
    %18 = vector.broadcast %16 : i32 to vector<8x1xi32>
    %19 = arith.addi %18, %17 : vector<8x1xi32>
    %c20_i32 = arith.constant 20 : i32
    %20 = vector.broadcast %c20_i32 : i32 to vector<8x1xi32>
    %21 = arith.cmpi slt, %19, %20 : vector<8x1xi32>
    %c0_i32_5 = arith.constant 0 : i32
    %22 = vector.broadcast %c0_i32_5 : i32 to vector<8x1xi32>
    %23 = arith.cmpi sge, %4, %22 : vector<8x1xi32>
    %24 = arith.andi %21, %23 : vector<8x1xi1>
    %c4_i32_6 = arith.constant 4 : i32
    %25 = vector.broadcast %c4_i32_6 : i32 to vector<8x1xi32>
    %26 = arith.cmpi slt, %4, %25 : vector<8x1xi32>
    %27 = arith.andi %24, %26 : vector<8x1xi1>
    %c4_i32_7 = arith.constant 4 : i32
    %28 = vector.broadcast %c4_i32_7 : i32 to vector<8x1xi32>
    %29 = arith.cmpi slt, %13, %28 : vector<8x1xi32>
    %30 = arith.andi %27, %29 : vector<8x1xi1>
    %c4_i32_8 = arith.constant 4 : i32
    %31 = vector.broadcast %c4_i32_8 : i32 to vector<8x1xi32>
    %32 = arith.muli %4, %31 : vector<8x1xi32>
    %33 = arith.addi %32, %13 : vector<8x1xi32>
    %c-1_i32 = arith.constant -1 : i32
    %34 = vector.broadcast %c-1_i32 : i32 to vector<8x1xi32>
    %35 = arith.select %30, %33, %34 : vector<8x1xi1>, vector<8x1xi32>
    %36 = tpu.iota {dimensions = array<i32: 1>} : vector<8x16xi32>
    %37 = vector.broadcast %35 : vector<8x1xi32> to vector<8x16xi32>
    %38 = arith.cmpi eq, %36, %37 : vector<8x16xi32>
    %39 = arith.extui %38 : vector<8x16xi1> to vector<8x16xi32>
    %40 = arith.sitofp %39 : vector<8x16xi32> to vector<8x16xf32>
    %41 = arith.truncf %40 : vector<8x16xf32> to vector<8x16xbf16>
    %cst_9 = arith.constant 1.000000e+00 : bf16
    %42 = vector.broadcast %cst_9 : bf16 to vector<1x8xbf16>
    %cst_10 = arith.constant dense<0.000000e+00> : vector<1x16xf32>
    %43 = tpu.matmul %42, %41, %cst_10 {dimension_numbers = #tpu.dot_dimension_numbers<[1], [0], [0], [1], [0, 0, 1, 1], [], []>} : vector<1x8xbf16>, vector<8x16xbf16>, vector<1x16xf32> -> vector<1x16xf32>
    %c0_11 = arith.constant 0 : index
    %c0_12 = arith.constant 0 : index
    %c0_13 = arith.constant 0 : index
    %44 = vector.load %arg4[%c0_11, %c0_12, %c0_13] : memref<1x1x16xf32, #tpu.memory_space<vmem>>, vector<1x1x16xf32>
    %45 = vector.shape_cast %44 : vector<1x1x16xf32> to vector<1x16xf32>
    %46 = arith.addf %45, %43 : vector<1x16xf32>
    %c0_14 = arith.constant 0 : index
    %c0_15 = arith.constant 0 : index
    %c0_16 = arith.constant 0 : index
    %47 = vector.load %arg4[%c0_14, %c0_15, %c0_16] : memref<1x1x16xf32, #tpu.memory_space<vmem>>, vector<1x1x16xf32>
    %48 = vector.shape_cast %47 : vector<1x1x16xf32> to vector<1x16xf32>
    %49 = vector.shape_cast %46 : vector<1x16xf32> to vector<1x1x16xf32>
    tpu.vector_store %arg4[%c0_14, %c0_15, %c0_16], %49 {strides = array<i32>} : memref<1x1x16xf32, #tpu.memory_space<vmem>>, vector<1x1x16xf32>,
    return
  }
  func.func @transform_0(%arg0: i32, %arg1: i32) -> (i32, i32) {
    %c2_i32 = arith.constant 2 : i32
    %0 = arith.muli %arg0, %c2_i32 : i32
    %1 = arith.addi %0, %arg1 : i32
    %c2_i32_0 = arith.constant 2 : i32
    %2 = arith.minsi %1, %c2_i32_0 : i32
    %c0_i32 = arith.constant 0 : i32
    %c0_i32_1 = arith.constant 0 : i32
    return %2, %c0_i32 : i32, i32
  }
  func.func @transform_1(%arg0: i32, %arg1: i32) -> (i32, i32) {
    %c2_i32 = arith.constant 2 : i32
    %0 = arith.muli %arg0, %c2_i32 : i32
    %1 = arith.addi %0, %arg1 : i32
    %c2_i32_0 = arith.constant 2 : i32
    %2 = arith.minsi %1, %c2_i32_0 : i32
    %c0_i32 = arith.constant 0 : i32
    %c0_i32_1 = arith.constant 0 : i32
    return %2, %c0_i32 : i32, i32
  }
  func.func @transform_2(%arg0: i32, %arg1: i32) -> (i32, i32, i32) {
    %c0_i32 = arith.constant 0 : i32
    %c0_i32_0 = arith.constant 0 : i32
    %c0_i32_1 = arith.constant 0 : i32
    return %arg0, %c0_i32, %c0_i32_0 : i32, i32, i32
  }
}

</mosaic_0001>

<bundles_post_ra>
// kernel: tpu_custom_call.1
= control target key start
LH: loop header
LB: loop body
LE: loop exit
PB: predicated region body
PF: predicated region fallthrough
CT: control target
= control target key end

     0   :  { %7 = vsyncpa [#allocation3], 0  ;;  %s807_s0 = inlined_call_operand.vmem [shape: f32[20,4], index: 0, kind: input, shape index: {}]   ;;  %s808_s1 = inlined_call_operand.vmem [shape: s32[20,1], index: 1, kind: input, shape index: {}]   ;;  %s809_s2 = inlined_call_operand.hbm [shape: f32[2,1,16], index: 2, kind: output, shape index: {}]  }
   0x1   :  { %9 = vsyncpa [#allocation3 + $0x1], 0  ;;  %s653_s9 = smov 0   ;;  %s655_s10 = smov 0  }
   0x2   :  { %s657_s11 = smov 0   ;;  %s659_s12 = smov 0  }
   0x3   :  { %s661_s13 = smov 0   ;;  %s663_s14 = smov 0  }
   0x4   :  { %s665_s15 = smov 0   ;;  %s667_s16 = smov 0  }
   0x5 LB: > { %s423_s17 = sadd.s32 4294967295, %s630_s16   ;;  %s424_s18 = sadd.s32 4294967294, %s630_s16   ;;  %s630_s16 = sphi %s667_s16, %s15_s16   ;;  %s626_s15 = sphi %s665_s15, %s818_s15   ;;  %s622_s14 = sphi %s663_s14, %s817_s14   ;;  %s618_s13 = sphi %s661_s13, %s816_s13   ;;  %s614_s12 = sphi %s659_s12, %s815_s12   ;;  %s610_s11 = sphi %s657_s11, %s814_s11   ;;  %s606_s10 = sphi %s655_s10, %s813_s10   ;;  %s602_s9 = sphi %s653_s9, %s812_s9  }
   0x6   : > { %s24_s19 = sadd.s32 1, %s622_s14  ;;  %s27_s20 = sadd.s32 1, %s626_s15 }
   0x7   : > { %p25_p0 = scmp.ge.s32.totalorder %s24_s19, 2  ;;  %p112_p1 = scmp.ne.s32.totalorder %s610_s11, %s606_s10 }
   0x8   : > { %p113_p2 = scmp.eq.s32.totalorder %s423_s17, 3  ;;  %p118_p4 = scmp.ne.s32.totalorder %s606_s10, %s602_s9 }
   0x9   : > { %s820_s19 = smov (%p25_p0, %s24_s19), 0  ;;  %s822_s20 = smov (!%p25_p0, %s27_s20), %s626_s15 }
   0xa   : > { %p702_p3 = por %p113_p2, %p112_p1  ;;  %p29_p5 = scmp.ge.s32.totalorder %s822_s20, 2 }
   0xb   : > { %p119_p6 = scmp.eq.s32.totalorder %s424_s18, 3  ;;  %p431_p7 = scmp.ge.s32.totalorder %s630_s16, 1 }
   0xc   : > { %p167_p8 = scmp.lt.s32.totalorder %s630_s16, 5  ;;  %s824_s20 = smov (%p29_p5, %s822_s20), 0 }
   0xd   : > { %p712_p9 = por %p119_p6, %p118_p4  ;;  %s99_s23 = ssub.s32 %s626_s15, %s824_s20 }
   0xe   : > { %p168_p10 = pnand %p431_p7, %p167_p8  ;;  %s102_s24 = sadd.s32 1, %s610_s11 }
   0xf   : > { %p100_p11 = scmp.eq.s32.totalorder %s99_s23, 0  ;;  %s197_s26 = sand.u32 (!%p168_p10), 1, %s606_s10  }
  0x10   : > { %171 = sbr.rel (%p168_p10) target bundleno = 839 (0x347), region = 28  ;;  %s432_s27 = sshll.u32 (!%p168_p10), %s618_s13, 1 }
  0x11   : > { %s720_s25 = scalar_select %p100_p11, %s610_s11, %s102_s24  }
  0x12   : > { %s725_s28 = sadd.s32 (!%p168_p10), %s614_s12, %s432_s27  ;;  %s739_s17 = scalar_lea.vmem (!%p168_p10), [#allocation2], %s197_s26 }
  0x13   : > { %p201_p12 = scmp.lt.s32.totalorder (!%p168_p10), %s725_s28, 2  ;;  %p442_p13 = scmp.ne.s32.totalorder (!%p168_p10), %s614_s12, 0 }
  0x17   : > { %s202_s29 = scalar_select %p201_p12, %s725_s28, 2 }
  0x18   : > { %228 = sbr.rel (%p442_p13) target bundleno = 31 (0x1f), region = 32  ;;  %vm229_vm0 = vcmask (!%p442_p13), 122880   ;;  %v632_v0 = vmov (!%p442_p13), 0.0  }
  0x19   : > { %s826_s29 = smov (!%p201_p12, %s202_s29), 2  ;;  %230 = vst.msk [vmem:[%s739_s17] sm:$0x1] (!%p442_p13), %vm229_vm0, %v632_v0 }
  0x1a   : > { %s436_s30 = sshll.u32 %s826_s29, 3 }
  0x1b   : > { %s206_s5 = scalar_lea.vmem %s807_s0, %s436_s30  ;;  %s735_s8 = scalar_lea.vmem %s808_s1, %s436_s30 }
  0x1f PF: > { %v231_v1 = vld [vmem:[%s206_s5] sm:$0xff]  ;;  %vm235_vm1 = vcmask 31744   ;;  %v233_v3 = vlaneseq  ;;  %v633_v14 = vmov 0   ;;  %v634_v15 = vmov 0.0   ;;  %s444_s12 = sshll.u32 %s725_s28, 3  ;;  %s447_s18 = sshll.u32 %s618_s13, 4 }
  0x20   : > { %v236_v2 = vsel %vm235_vm1, %v231_v1, -inf  ;;  %534 = vset.pattern.permute.xlu1 %v633_v14  ;;  %535 = vset.pattern.permute.xlu0 %v633_v14  ;;  %v261_v17 = vstv %s444_s12  ;;  %v232_v19 = vld [vmem:[%s735_s8] sm:$0xff]  ;;  %vm635_vm11 = vmmov 0   ;;  %vm284_vm13 = vcmask 1043456   ;;  %s345_s23 = sshll.u32 %s739_s17, 4  ;;  %s751_s28 = scalar_lea.hbm %s809_s2, %s447_s18  ;;  %s753_s23 = int_to_ptr.vmem [resolvable:$true] %s345_s23 }
  0x21   : > { %237 = vmax.xlane.f32.xlu0 %v236_v2  ;;  %v234_v4 = vand.u32 127, %v233_v3  ;;  %452 = vmatprep.subr.bf16.mxu0 %v634_v15  ;;  %v260_v16 = vshrl.u32 %v233_v3, 7  ;;  %vm264_vm5 = vcmp.ge.s32.totalorder %v232_v19, 0  ;;  %vm266_vm7 = vcmp.lt.s32.totalorder %v232_v19, 4  ;;  %v328_v33 = vld [vmem:[%s739_s17] sm:$0x1] }
  0x22   : > { %v270_v24 = vmul.u32 4, %v232_v19  ;;  %454 = vmatprep.mubr.msk.bf16.mxu0 %vm635_vm11, %v634_v15  ;;  %vm280_vm14 = vcmask 64512   ;;  %v636_v32 = vmov 1065369472   ;;  %vm330_vm15 = vcmask 122880   ;;  %s333_s13 = scalar_lea.sflag [#allocation3], %s197_s26 }
  0x23   : > { %v262_v18 = vadd.s32 %v261_v17, %v260_v16  ;;  %s536_s29 = scalar_lea.vmem %s753_s23, 16  ;;  %s637_s30 = smov [#allocation2]  }
  0x24   : > { %p537_p0 = scmp.ne.s32.totalorder %s753_s23, %s536_s29  ;;  %s540_s3 = sshll.u32 %s637_s30, 4  ;;  %s541_s3 = int_to_ptr.vmem [resolvable:$false] %s540_s3 }
  0x25   : > { %vm263_vm4 = vcmp.lt.s32.totalorder %v262_v18, 20  ;;  %s542_s4 = scalar_lea.vmem %s541_s3, 32  ;;  %p543_p4 = scmp.lt.s32.totalorder %s753_s23, %s541_s3 }
  0x26   : > { %vm265_vm6 = vmand %vm263_vm4, %vm264_vm5  ;;  %p538_p1 = pnand %p537_p0, %p702_p3  ;;  %p544_p5 = scmp.lt.s32.totalorder %s542_s4, %s536_s29 }
  0x27   : > { %vm267_vm8 = vmand %vm265_vm6, %vm266_vm7 }
  0x28   : > { %p539_p2 = pneg %p538_p1  ;;  %p545_p6 = por %p544_p5, %p543_p4 }
  0x2a   : > { %p546_p7 = pnand %p545_p6, %p539_p2 }
  0xae   : > { %v238_v5 = vpop.xlane.xlu0 %237 }
  0xaf   : > { %vm239_vm2 = vcmp.eq.f32.partialorder %v231_v1, %v238_v5 }
  0xb0   : > { %v240_v6 = vsel %vm239_vm2, %v234_v4, 4 }
  0xb1   : > { %v241_v7 = vsel %vm235_vm1, %v240_v6, 2147483647 }
  0xb2   : > { %v243_v8 = vshra.s32 %v241_v7, 16  ;;  %v242_v10 = vand.u32 65535, %v241_v7 }
  0xb4   : > { %v245_v9 = vcvt.s32.f32 %v243_v8  ;;  %v244_v12 = vcvt.s32.f32 %v242_v10 }
  0xb6   : > { %246 = vmin.xlane.f32.xlu0 %v245_v9 }
 0x143   : > { %v247_v11 = vpop.xlane.xlu0 %246 }
 0x144   : > { %vm248_vm3 = vcmp.eq.f32.partialorder %v245_v9, %v247_v11  ;;  %v253_v20 = vcvt.f32.s32 %v247_v11 }
 0x145   : > { %v249_v13 = vsel %vm248_vm3, %v244_v12, inf }
 0x146   : > { %250 = vmin.xlane.f32.xlu1 %v249_v13  ;;  %v254_v22 = vshll.u32 %v253_v20, 16 }
 0x1d3   : > { %v251_v21 = vpop.xlane.xlu1 %250 }
 0x1d4   : > { %v252_v23 = vcvt.f32.s32 %v251_v21 }
 0x1d6   : > { %v255_v25 = vadd.s32 %v254_v22, %v252_v23 }
 0x1d8   : > { %vm268_vm9 = vcmp.lt.s32.totalorder %v255_v25, 4  ;;  %v271_v26 = vadd.s32 %v270_v24, %v255_v25 }
 0x1d9   : > { %vm269_vm10 = vmand %vm267_vm8, %vm268_vm9 }
 0x1da   : > { %v272_v27 = vsel %vm269_vm10, %v271_v26, 4294967295 }
 0x1db   : > { %274 = vperm.xlu1 %534, %v272_v27  }
 0x25a   : > { %v275_v28 = vpop.permute.xlu1 %274 }
 0x25b   : > { %vm276_vm12 = vcmp.eq.s32.totalorder %v234_v4, %v275_v28 }
 0x25c   : > { %v445_v29 = vsel %vm276_vm12, 1.0, %v634_v15 }
 0x25d   : > { %v279_v30 = vpack.c.bf16 %v445_v29, %v445_v29 }
 0x25f   : > { %v286_v31 = vsel %vm284_vm13, %v279_v30, 0 }
 0x260   : > { %453 = vmatpush3.bf16.msra.mxu0 %v286_v31 }
 0x263   : > { %455 = vmatmul.mubr.msk.bf16.vlgmr.msra.gmra.mrb[0].mxu0 %vm280_vm14, %v636_v32 }
 0x336   : > { %v322_v34 = vpop.f32.mrb[0].mxu0 }
 0x337   : > { %v329_v35 = vadd.f32 %v328_v33, %v322_v34  ;;  %v456_v36 = vpop.f32.mrb[1].mxu0 }
 0x338   : > { %v325_v37 = vpop.f32.mrb[2].mxu0 }
 0x339   : > { %v457_v38 = vpop.f32.mrb[3].mxu0  ;;  %331 = vst.msk [vmem:[%s739_s17] sm:$0x1] %vm330_vm15, %v329_v35 }
 0x33a   : > { %549 = shalt.err (!%p546_p7)
}
 0x33b   : > { %s550_s26 = scalar_lea.hbm %s751_s28, 16  ;;  %s554_s7 = scalar_lea.hbm %s809_s2, 32 }
 0x33c   : > { %p551_p8 = scmp.ne.s32.totalorder %s751_s28, %s550_s26  ;;  %p555_p12 = scmp.lt.u32.totalorder %s751_s28, %s809_s2 }
 0x33d   : > { %p556_p13 = scmp.lt.u32.totalorder %s554_s7, %s550_s26  ;;  %p558_p1 = scmp.lt.u32.totalorder %s550_s26, %s751_s28 }
 0x33e   : > { %p552_p10 = pnand %p551_p8, %p702_p3 }
 0x33f   : > { %p557_p0 = por %p556_p13, %p555_p12 }
 0x340   : > { %p553_p11 = pneg %p552_p10 }
 0x341   : > { %p559_p2 = por %p558_p1, %p557_p0 }
 0x343   : > { %p560_p4 = pnand %p559_p2, %p553_p11 }
 0x345   : > { %563 = shalt.err (!%p560_p4)
}
 0x346   : > { %458 = dma.vmem_to_hbm [thread:$0]  (%p702_p3), %s753_s23, 16, %s751_s28, %s333_s13  }
 0x347 PF: > { %p464_p5 = scmp.ge.s32.totalorder %s630_s16, 2  ;;  %s357_s12 = sand.u32 1, %s602_s9  }
 0x348   : > { %s358_s18 = scalar_lea.sflag [#allocation3], %s357_s12 }
 0x349   : > { %p461_p6 = pnand %p464_p5, %p712_p9 }
 0x34b   : > { %597 = dma.done.wait (!%p461_p6), %s358_s18, 16  }
 0x34c   : > { %599 = vsyncadd (!%p461_p6), %s358_s18, 4294967280  ;;  %s15_s16 = sadd.s32 1, %s630_s16   ;;  %s812_s9 = smov %s606_s10 }
 0x34d   : > { %p12_p7 = scmp.ge.s32.totalorder %s15_s16, 6   ;;  %s813_s10 = smov %s610_s11 }
 0x34e   : > { %s814_s11 = smov %s720_s25  ;;  %s815_s12 = smov %s622_s14 }
 0x34f   : > { %s816_s13 = smov %s626_s15  ;;  %s817_s14 = smov %s820_s19 }
 0x350   : > { %s818_s15 = smov %s824_s20  ;;  %14 = sbr.rel (!%p12_p7) target bundleno = 5 (0x5), region = 70 }
 0x357   :  { %362 = vsyncpa [#allocation3], 1 }
 0x358   :  { %364 = vsyncpa [#allocation3 + $0x1], 1 }

</bundles_post_ra>
